<compile_context>
chip_gen: v5e
topology: v5e:2x2
jax: 0.10.0
libtpu: 0.0.40
codegen_flags: <defaults>
</compile_context>

<pallas_src>
import functools

import jax
import jax.numpy as jnp
from jax.experimental import pallas as pl
from jax.experimental.pallas import tpu as pltpu


def _layernorm_kernel(x_ref, a_ref, b_ref, o_ref, *, eps, hidden, norm_in_io_dtype):
    # x_ref: (row_tile, H)   a_ref/b_ref: (1, H)   o_ref: (row_tile, H)
    x = x_ref[...]                                   # input dtype
    xf = x.astype(jnp.float32)

    # Single fused stats pass: sum(x) and sum(x*x) -> mean, unbiased var.
    s1 = jnp.sum(xf, axis=-1, keepdims=True)         # (rows, 1)
    s2 = jnp.sum(xf * xf, axis=-1, keepdims=True)    # (rows, 1)
    mean = s1 * jnp.float32(1.0 / hidden)
    # torch.std is unbiased (Bessel): divide by N-1. Clamp >= 0 against
    # catastrophic cancellation on near-constant rows.
    var = jnp.maximum((s2 - s1 * mean) * jnp.float32(1.0 / (hidden - 1)), 0.0)
    std = jnp.sqrt(var)
    # Per-row 1/(std + eps); EUP approx path is plenty for bf16 outputs.
    inv = pl.reciprocal(std + jnp.float32(eps), approx=norm_in_io_dtype)

    if norm_in_io_dtype:
        # bf16 normalize pass: stats stay f32, elementwise work runs packed
        # (2 elems / 32-bit lane on v6e / v7x). Correct (just not faster) on v5e.
        dt = o_ref.dtype
        y = (a_ref[...].astype(dt) * ((x - mean.astype(dt)) * inv.astype(dt))
             + b_ref[...].astype(dt))
        o_ref[...] = y
    else:
        y = (a_ref[...].astype(jnp.float32) * ((xf - mean) * inv)
             + b_ref[...].astype(jnp.float32))
        o_ref[...] = y.astype(o_ref.dtype)


def _round_down(v, m):
    return (v // m) * m


def _round_up(v, m):
    return ((v + m - 1) // m) * m


def _vmem_config():
    """(per-tile VMEM byte budget, vmem_limit_bytes) by chip generation."""
    phys = 64 * 1024 * 1024  # conservative default (v7x per-TC VMEM)
    try:
        phys = int(pltpu.get_tpu_info().vmem_capacity_bytes)
    except Exception:
        pass
    if phys >= 128 * 1024 * 1024:          # v5e / v6e: 128 MiB physical VMEM
        return 32 * 1024 * 1024, 96 * 1024 * 1024
    # v7x: 64 MiB per TC — leave headroom for f32 intermediates + double buffers.
    return 12 * 1024 * 1024, 40 * 1024 * 1024


def _pick_row_tile(n_rows, hidden, itemsize, tile_budget_bytes):
    """Largest row tile whose blocks + f32 intermediates fit the budget."""
    # Sublane packing: bf16/fp16 want multiples of 16 rows, f32 wants 8.
    sub = 16 if itemsize <= 2 else 8
    # 2 (double buffer) * 2 (input + output) * H * itemsize  I/O bytes per row,
    # plus ~2 live f32 (rows, H) intermediates inside the kernel body.
    bytes_per_row = 4 * hidden * itemsize + 2 * 4 * hidden
    row_tile = max(sub, tile_budget_bytes // bytes_per_row)
    row_tile = max(sub, _round_down(min(row_tile, 4096), sub))
    # Don't exceed the (sublane-rounded) total row count.
    row_tile = min(row_tile, _round_up(n_rows, sub))
    # Keep >= ~8 grid steps (>= 4 per core on v7x) once >=256-row tiles are
    # affordable, so DMA/compute overlap is real while per-step overhead
    # (~0.35 us) stays negligible.
    if n_rows >= 2 * 256:
        steps_cap = max(256, _round_down(n_rows // 8, sub))
        row_tile = min(row_tile, steps_cap)
    return row_tile


def layer_norm(x, a_2, b_2, eps=1e-6, row_tile=None):
    """x: (..., H). a_2, b_2: (H,). Returns same shape/dtype as x."""
    orig_shape = x.shape
    H = orig_shape[-1]
    assert H >= 2, "LayerNorm over a single element: torch.std would be NaN"
    x2 = x.reshape(-1, H)
    R = x2.shape[0]

    tile_budget, vmem_limit = _vmem_config()
    if row_tile is None:
        row_tile = _pick_row_tile(R, H, jnp.dtype(x.dtype).itemsize, tile_budget)

    n_tiles = pl.cdiv(R, row_tile)  # boundary block handled by Pallas, no pad/slice

    a2 = a_2.reshape(1, H)
    b2 = b_2.reshape(1, H)

    norm_in_io_dtype = bool(x.dtype == jnp.bfloat16)

    out = pl.pallas_call(
        functools.partial(
            _layernorm_kernel,
            eps=float(eps),
            hidden=H,
            norm_in_io_dtype=norm_in_io_dtype,
        ),
        out_shape=jax.ShapeDtypeStruct((R, H), x.dtype),
        grid_spec=pltpu.PrefetchScalarGridSpec(
            num_scalar_prefetch=0,
            grid=(n_tiles,),
            in_specs=[
                pl.BlockSpec((row_tile, H), lambda i: (i, 0)),
                pl.BlockSpec((1, H), lambda i: (0, 0)),
                pl.BlockSpec((1, H), lambda i: (0, 0)),
            ],
            out_specs=pl.BlockSpec((row_tile, H), lambda i: (i, 0)),
        ),
        compiler_params=pltpu.CompilerParams(
            dimension_semantics=("parallel",),
            vmem_limit_bytes=vmem_limit,
        ),
    )(x2, a2, b2)

    return out.reshape(orig_shape)


def _reference(x, a_2, b_2, eps, hidden):
    mean = jnp.mean(x, axis=-1, keepdims=True)
    std = jnp.sqrt(jnp.sum((x - mean) ** 2, axis=-1, keepdims=True) / (hidden - 1))
    return a_2 * (x - mean) / (std + eps) + b_2


if __name__ == "__main__":
    key = jax.random.PRNGKey(0)
    k1, k2 = jax.random.split(key)

    # Shapes implied by the module: (batch, seq, hidden) with LayerNorm(hidden).
    batch, seq, hidden = 2, 8, 32
    x = jax.random.normal(k1, (batch, seq, hidden), dtype=jnp.float32)
    a_2 = jnp.ones((hidden,), dtype=jnp.float32)
    b_2 = jnp.zeros((hidden,), dtype=jnp.float32)
    eps = 1e-6

    y = jax.block_until_ready(layer_norm(x, a_2, b_2, eps=eps))
    ref = _reference(x, a_2, b_2, eps, hidden)
    assert y.shape == x.shape and y.dtype == x.dtype
    assert jnp.allclose(y, ref, atol=1e-4, rtol=1e-4), "f32 mismatch vs reference"

    # Multi-step grid with a non-divisible row tail (no wrapper pad/slice).
    H2 = 256
    x2 = jax.random.normal(k2, (8, 125, H2), dtype=jnp.float32)  # 1000 rows
    a2 = jnp.ones((H2,), dtype=jnp.float32)
    b2 = jnp.zeros((H2,), dtype=jnp.float32)
    y2 = jax.block_until_ready(layer_norm(x2, a2, b2, eps=eps))
    ref2 = _reference(x2, a2, b2, eps, H2)
    assert jnp.allclose(y2, ref2, atol=1e-4, rtol=1e-4), "tail-block mismatch"

    # bf16 path (packed normalize pass, f32 stats).
    xb = x2.astype(jnp.bfloat16)
    yb = jax.block_until_ready(layer_norm(xb, a2, b2, eps=eps))
    refb = _reference(xb.astype(jnp.float32), a2, b2, eps, H2)
    assert yb.dtype == jnp.bfloat16
    assert jnp.allclose(yb.astype(jnp.float32), refb, atol=1e-1, rtol=1e-1), (
        "bf16 mismatch vs reference")

    print("KERNEL_OK")
</pallas_src>

<mosaic_0001>
module attributes {stable_mosaic.version = 11 : i64} {
  func.func @_layernorm_kernel(%arg0: i32, %arg1: memref<16x32xf32, #tpu.memory_space<vmem>>, %arg2: memref<1x32xf32, #tpu.memory_space<vmem>>, %arg3: memref<1x32xf32, #tpu.memory_space<vmem>>, %arg4: memref<16x32xf32, #tpu.memory_space<vmem>>) attributes {dimension_semantics = [#tpu.dimension_semantics<parallel>], iteration_bounds = array<i64: 1>, scalar_prefetch = 0 : i64, scratch_operands = 0 : i64, tpu.core_type = #tpu.core_type<tc>, window_params = [{transform_indices = @transform_0, window_bounds = array<i64: 16, 32>}, {pipeline_mode = #tpu.pipeline_mode<synchronous>, transform_indices = @transform_1, window_bounds = array<i64: 1, 32>}, {pipeline_mode = #tpu.pipeline_mode<synchronous>, transform_indices = @transform_2, window_bounds = array<i64: 1, 32>}, {transform_indices = @transform_3, window_bounds = array<i64: 16, 32>}]} {
    %c0 = arith.constant 0 : index
    %c0_0 = arith.constant 0 : index
    %0 = vector.load %arg1[%c0, %c0_0] : memref<16x32xf32, #tpu.memory_space<vmem>>, vector<16x32xf32>
    %cst = arith.constant dense<0.000000e+00> : vector<16xf32>
    %1 = vector.multi_reduction <add>, %0, %cst [1] : vector<16x32xf32> to vector<16xf32>
    %2 = vector.shape_cast %1 : vector<16xf32> to vector<16x1xf32>
    %3 = arith.mulf %0, %0 : vector<16x32xf32>
    %cst_1 = arith.constant dense<0.000000e+00> : vector<16xf32>
    %4 = vector.multi_reduction <add>, %3, %cst_1 [1] : vector<16x32xf32> to vector<16xf32>
    %5 = vector.shape_cast %4 : vector<16xf32> to vector<16x1xf32>
    %cst_2 = arith.constant 3.125000e-02 : f32
    %6 = vector.broadcast %cst_2 : f32 to vector<16x1xf32>
    %7 = arith.mulf %2, %6 : vector<16x1xf32>
    %8 = arith.mulf %2, %7 : vector<16x1xf32>
    %9 = arith.subf %5, %8 : vector<16x1xf32>
    %cst_3 = arith.constant 0.0322580636 : f32
    %10 = vector.broadcast %cst_3 : f32 to vector<16x1xf32>
    %11 = arith.mulf %9, %10 : vector<16x1xf32>
    %cst_4 = arith.constant 0.000000e+00 : f32
    %12 = vector.broadcast %cst_4 : f32 to vector<16x1xf32>
    %13 = arith.maximumf %11, %12 : vector<16x1xf32>
    %14 = math.sqrt %13 : vector<16x1xf32>
    %cst_5 = arith.constant 9.99999997E-7 : f32
    %15 = vector.broadcast %cst_5 : f32 to vector<16x1xf32>
    %16 = arith.addf %14, %15 : vector<16x1xf32>
    %17 = tpu.reciprocal %16 : vector<16x1xf32> -> vector<16x1xf32>
    %c0_6 = arith.constant 0 : index
    %c0_7 = arith.constant 0 : index
    %18 = vector.load %arg2[%c0_6, %c0_7] : memref<1x32xf32, #tpu.memory_space<vmem>>, vector<1x32xf32>
    %19 = vector.broadcast %7 : vector<16x1xf32> to vector<16x32xf32>
    %20 = arith.subf %0, %19 : vector<16x32xf32>
    %21 = vector.broadcast %17 : vector<16x1xf32> to vector<16x32xf32>
    %22 = arith.mulf %20, %21 : vector<16x32xf32>
    %23 = vector.broadcast %18 : vector<1x32xf32> to vector<16x32xf32>
    %24 = arith.mulf %23, %22 : vector<16x32xf32>
    %c0_8 = arith.constant 0 : index
    %c0_9 = arith.constant 0 : index
    %25 = vector.load %arg3[%c0_8, %c0_9] : memref<1x32xf32, #tpu.memory_space<vmem>>, vector<1x32xf32>
    %26 = vector.broadcast %25 : vector<1x32xf32> to vector<16x32xf32>
    %27 = arith.addf %24, %26 : vector<16x32xf32>
    %c0_10 = arith.constant 0 : index
    %c0_11 = arith.constant 0 : index
    %28 = vector.load %arg4[%c0_10, %c0_11] : memref<16x32xf32, #tpu.memory_space<vmem>>, vector<16x32xf32>
    tpu.vector_store %arg4[%c0_10, %c0_11], %27 {strides = array<i32>} : memref<16x32xf32, #tpu.memory_space<vmem>>, vector<16x32xf32>,
    return
  }
  func.func @transform_0(%arg0: i32) -> (i32, i32) {
    %c0_i32 = arith.constant 0 : i32
    %c0_i32_0 = arith.constant 0 : i32
    return %arg0, %c0_i32 : i32, i32
  }
  func.func @transform_1(%arg0: i32) -> (i32, i32) {
    %c0_i32 = arith.constant 0 : i32
    %c0_i32_0 = arith.constant 0 : i32
    %c0_i32_1 = arith.constant 0 : i32
    return %c0_i32, %c0_i32_0 : i32, i32
  }
  func.func @transform_2(%arg0: i32) -> (i32, i32) {
    %c0_i32 = arith.constant 0 : i32
    %c0_i32_0 = arith.constant 0 : i32
    %c0_i32_1 = arith.constant 0 : i32
    return %c0_i32, %c0_i32_0 : i32, i32
  }
  func.func @transform_3(%arg0: i32) -> (i32, i32) {
    %c0_i32 = arith.constant 0 : i32
    %c0_i32_0 = arith.constant 0 : i32
    return %arg0, %c0_i32 : i32, i32
  }
}

</mosaic_0001>

<bundles_post_ra>
// kernel: tpu_custom_call.1
= control target key start
LH: loop header
LB: loop body
LE: loop exit
PB: predicated region body
PF: predicated region fallthrough
CT: control target
= control target key end

     0   :  { %8 = vsyncpa [#allocation3], 0  ;;  %s322_s0 = inlined_call_operand.hbm [shape: f32[16,32], index: 0, kind: input, shape index: {}]   ;;  %s323_s1 = inlined_call_operand.hbm [shape: f32[1,32], index: 1, kind: input, shape index: {}]   ;;  %s324_s2 = inlined_call_operand.vmem [shape: f32[1,32], index: 2, kind: input, shape index: {}]   ;;  %s325_s3 = inlined_call_operand.hbm [shape: f32[16,32], index: 3, kind: output, shape index: {}]  }
   0x1   :  { %9 = vsyncpa [#allocation6], 0 }
   0x2   :  { %10 = vsyncpa [#allocation4], 0  ;;  %s15_s14 = sshll.u32 %s322_s0, 4  ;;  %s257_s15 = smov [#allocation2]   ;;  %s16_s14 = int_to_ptr.hbm [resolvable:$true] %s15_s14 }
   0x3   :  { %s17_s16 = sshll.u32 %s257_s15, 4  ;;  %s29_s19 = sshll.u32 %s323_s1, 4  ;;  %s18_s16 = int_to_ptr.vmem [resolvable:$true] %s17_s16  ;;  %s30_s19 = int_to_ptr.hbm [resolvable:$true] %s29_s19 }
   0x4   :  { %s258_s20 = smov 128   ;;  %s259_s21 = smov 8  }
   0x5   :  { %23 = dma.hbm_to_vmem [thread:$0]  %s16_s14, 256, %s18_s16, [#allocation3], %s258_s20, %s258_s20, %s259_s21  }
   0x6   :  { %s260_s22 = smov [#allocation5]  }
   0x7   :  { %s31_s23 = sshll.u32 %s260_s22, 4  ;;  %s32_s23 = int_to_ptr.vmem [resolvable:$true] %s31_s23 }
   0x8   :  { %34 = dma.hbm_to_vmem [thread:$0]  %s30_s19, 16, %s32_s23, [#allocation6]  }
   0x9   :  { %251 = dma.done.wait [#allocation3], 256  }
   0xa   :  { %252 = vsyncadd [#allocation3], 4294967040 }
   0xb   :  { %253 = dma.done.wait [#allocation6], 16  }
   0xc   :  { %254 = vsyncadd [#allocation6], 4294967280  ;;  %vm47_vm0 = vcmask 261120   ;;  %v291_v0 = vld [vmem:[#allocation2] sm:$0xff]  ;;  %v298_v4 = vld [vmem:[#allocation2 + $0x8] sm:$0xff]  ;;  %s150_s27 = sshll.u32 %s325_s3, 4  ;;  %s151_s27 = int_to_ptr.hbm [resolvable:$true] %s150_s27 }
   0xd   :  { %v48_v1 = vsel %vm47_vm0, %v291_v0, 0.0  ;;  %v54_v2 = vmul.f32 %v291_v0, %v291_v0  ;;  %v55_v5 = vmul.f32 %v298_v4, %v298_v4  ;;  %v51_v6 = vsel %vm47_vm0, %v298_v4, 0.0  ;;  %v169_v55 = vld [vmem:[#allocation5] ss:$0 sm:$0xff]  ;;  %v170_v59 = vld [vmem:[%s324_s2] ss:$0 sm:$0xff] }
   0xe   :  { %49 = vadd.xlane.f32.xlu0 %v48_v1  ;;  %s261_s2 = smov [#allocation7]  }
   0xf   :  { %v56_v3 = vsel %vm47_vm0, %v54_v2, 0.0  ;;  %v59_v7 = vsel %vm47_vm0, %v55_v5, 0.0  ;;  %s148_s24 = sshll.u32 %s261_s2, 4  ;;  %s149_s24 = int_to_ptr.vmem [resolvable:$true] %s148_s24 }
  0x10   :  { %57 = vadd.xlane.f32.xlu1 %v56_v3 }
  0x16   :  { %52 = vadd.xlane.f32.xlu0 %v51_v6 }
  0x18   :  { %60 = vadd.xlane.f32.xlu1 %v59_v7 }
  0x81   :  { %v50_v8 = vpop.xlane.xlu0 %49 }
  0x82   :  { %v62_v9 = vmul.f32 0.03125, %v50_v8 }
  0x83   :  { %v58_v10 = vpop.xlane.xlu1 %57 }
  0x84   :  { %v64_v11 = vmul.f32 %v62_v9, %v50_v8  ;;  %v127_v53 = vsub.f32 %v291_v0, %v62_v9 }
  0x86   :  { %v66_v12 = vsub.f32 %v58_v10, %v64_v11 }
  0x88   :  { %v68_v13 = vmul.f32 0.032258064, %v66_v12 }
  0x89   :  { %v53_v14 = vpop.xlane.xlu0 %52 }
  0x8a   :  { %v70_v15 = vmax.f32 %v68_v13, 0.0  ;;  %v305_v16 = vmul.f32 0.03125, %v53_v14 }
  0x8b   :  { %v61_v17 = vpop.xlane.xlu1 %60 }
  0x8c   :  { %171 = vrsqrt.f32 %v70_v15  ;;  %v65_v18 = vmul.f32 %v305_v16, %v53_v14  ;;  %vm79_vm1 = vcmp.eq.f32.partialorder %v70_v15, inf  ;;  %v82_v31 = vand.u32 2147483648, %v70_v15 }
  0x8d   :  { %vm81_vm2 = vcmp.eq.f32.partialorder %v70_v15, 0.0  ;;  %v128_v5 = vsub.f32 %v298_v4, %v305_v16 }
  0x8e   :  { %v67_v19 = vsub.f32 %v61_v17, %v65_v18 }
  0x90   :  { %v69_v20 = vmul.f32 0.032258064, %v67_v19 }
  0x92   :  { %v172_v21 = vpop.eup %171  ;;  %v71_v23 = vmax.f32 %v69_v20, 0.0 }
  0x93   :  { %v73_v22 = vmul.f32 %v172_v21, %v70_v15 }
  0x94   :  { %173 = vrsqrt.f32 %v71_v23  ;;  %vm91_vm3 = vcmp.eq.f32.partialorder %v71_v23, inf  ;;  %v94_v40 = vand.u32 2147483648, %v71_v23  ;;  %vm93_vm4 = vcmp.eq.f32.partialorder %v71_v23, 0.0 }
  0x95   :  { %v74_v24 = vmul.f32 %v172_v21, %v73_v22 }
  0x97   :  { %v75_v25 = vmul.f32 0.5, %v74_v24 }
  0x99   :  { %v76_v26 = vsub.f32 1.5, %v75_v25 }
  0x9a   :  { %v174_v27 = vpop.eup %173 }
  0x9b   :  { %v77_v28 = vmul.f32 %v172_v21, %v76_v26  ;;  %v85_v29 = vmul.f32 %v174_v27, %v71_v23 }
  0x9d   :  { %v78_v30 = vmul.f32 %v77_v28, %v70_v15  ;;  %v86_v32 = vmul.f32 %v174_v27, %v85_v29 }
  0x9f   :  { %v80_v33 = vsel %vm79_vm1, %v70_v15, %v78_v30  ;;  %v87_v35 = vmul.f32 0.5, %v86_v32 }
  0xa0   :  { %v83_v34 = vsel %vm81_vm2, %v82_v31, %v80_v33 }
  0xa1   :  { %v96_v36 = vadd.f32 1e-06, %v83_v34  ;;  %v88_v37 = vsub.f32 1.5, %v87_v35 }
  0xa3   :  { %175 = vrcp.f32 %v96_v36  ;;  %v89_v38 = vmul.f32 %v174_v27, %v88_v37  ;;  %v109_v47 = vand.u32 2147483648, %v96_v36  ;;  %v107_v49 = vand.u32 2147483647, %v96_v36 }
  0xa4   :  { %vm103_vm6 = vweird.f32 %v96_v36 }
  0xa5   :  { %v90_v39 = vmul.f32 %v89_v38, %v71_v23  ;;  %v110_v51 = vor.u32 1.1754944e-38, %v109_v47  ;;  %vm108_vm8 = vcmp.eq.f32.partialorder %v107_v49, 8.507059e+37 }
  0xa7   :  { %v92_v41 = vsel %vm91_vm3, %v71_v23, %v90_v39 }
  0xa8   :  { %v95_v43 = vsel %vm93_vm4, %v94_v40, %v92_v41 }
  0xa9   :  { %v176_v42 = vpop.eup %175  ;;  %v97_v44 = vadd.f32 1e-06, %v95_v43 }
  0xaa   :  { %v99_v45 = vmul.f32 %v176_v42, %v96_v36  ;;  %vm104_vm5 = vweird.f32 %v176_v42 }
  0xab   :  { %177 = vrcp.f32 %v97_v44  ;;  %vm105_vm7 = vmor %vm103_vm6, %vm104_vm5  ;;  %v123_v61 = vand.u32 2147483648, %v97_v44  ;;  %v121_v1 = vand.u32 2147483647, %v97_v44  ;;  %vm117_vm10 = vweird.f32 %v97_v44 }
  0xac   :  { %v100_v46 = vsub.f32 1.0, %v99_v45 }
  0xad   :  { %v124_v0 = vor.u32 1.1754944e-38, %v123_v61  ;;  %vm122_vm12 = vcmp.eq.f32.partialorder %v121_v1, 8.507059e+37 }
  0xae   :  { %v101_v48 = vmul.f32 %v176_v42, %v100_v46 }
  0xb0   :  { %v102_v50 = vadd.f32 %v176_v42, %v101_v48 }
  0xb1   :  { %v178_v52 = vpop.eup %177 }
  0xb2   :  { %v106_v54 = vsel %vm105_vm7, %v176_v42, %v102_v50  ;;  %v113_v57 = vmul.f32 %v178_v52, %v97_v44  ;;  %vm118_vm9 = vweird.f32 %v178_v52 }
  0xb3   :  { %v111_v56 = vsel %vm108_vm8, %v110_v51, %v106_v54  ;;  %vm119_vm11 = vmor %vm117_vm10, %vm118_vm9 }
  0xb4   :  { %v129_v58 = vmul.f32 %v127_v53, %v111_v56  ;;  %v114_v60 = vsub.f32 1.0, %v113_v57 }
  0xb6   :  { %v134_v62 = vmul.f32 %v169_v55, %v129_v58  ;;  %v115_v63 = vmul.f32 %v178_v52, %v114_v60 }
  0xb8   :  { %v140_v2 = vadd.f32 %v170_v59, %v134_v62  ;;  %v116_v3 = vadd.f32 %v178_v52, %v115_v63 }
  0xba   :  { %142 = vst.msk [vmem:[#allocation7] sm:$0xff] %vm47_vm0, %v140_v2  ;;  %v120_v6 = vsel %vm119_vm11, %v178_v52, %v116_v3 }
  0xbb   :  { %v125_v7 = vsel %vm122_vm12, %v124_v0, %v120_v6 }
  0xbc   :  { %v130_v8 = vmul.f32 %v128_v5, %v125_v7 }
  0xbe   :  { %v135_v9 = vmul.f32 %v169_v55, %v130_v8 }
  0xc0   :  { %v141_v10 = vadd.f32 %v170_v59, %v135_v9 }
  0xc2   :  { %143 = vst.msk [vmem:[#allocation7 + $0x8] sm:$0xff] %vm47_vm0, %v141_v10 }
  0xc3   :  { %156 = dma.vmem_to_hbm [thread:$0]  %s149_s24, 256, %s151_s27, [#allocation4], %s258_s20, %s258_s20, %s259_s21  }
  0xc4   :  { %255 = dma.done.wait [#allocation4], 256  }
  0xc5   :  { %256 = vsyncadd [#allocation4], 4294967040 }
  0xc6   :  { %161 = vsyncpa [#allocation3], 1 }
  0xc7   :  { %162 = vsyncpa [#allocation6], 1 }
  0xc8   :  { %163 = vsyncpa [#allocation4], 1 }

</bundles_post_ra>
